<compile_context>
chip_gen: v5e
topology: v5e:2x2
jax: 0.10.0
libtpu: 0.0.40
codegen_flags: <defaults>
</compile_context>

<pallas_src>
import functools

import jax
import jax.numpy as jnp
from jax.experimental import pallas as pl
from jax.experimental.pallas import tpu as pltpu

GAMMA_ = 0.1      # deterministic "parameter" from __init__(tau, gamma_)
TAU = 0.05        # unused in forward (Similarity is never called) -- kept for parity
EPS = 1e-07

_MXU_MAX_N_PAD = 1024              # above this the resident triangular matrix
                                   # (2 pipeline buffers x N_pad^2 x 4B) is too big
_VMEM_BUDGET = 28 * 1024 * 1024    # fits default scoped VMEM on v6e/v7x, well
                                   # under v7x's 64 MiB physical VMEM


def _listmle_mxu_kernel(preds_ref, tri_ref, out_ref, *, eps):
    # preds_ref: (TB, N_pad) block, already sorted by teacher score, with -inf
    # sentinels marking teacher == -1 and all padding.
    preds = preds_ref[...].astype(jnp.float32)
    neg_inf = jnp.float32(-jnp.inf)
    mask = preds == neg_inf

    max_pred = jnp.max(preds, axis=-1, keepdims=True)
    # Fully-masked rows (batch padding) would give -inf; clamp so no NaNs.
    max_pred = jnp.where(max_pred == neg_inf, jnp.float32(0.0), max_pred)

    x = preds - max_pred                 # masked lanes -> -inf
    ex = jnp.exp(x)                      # masked lanes -> 0

    # Reversed (suffix) cumulative sum on the MXU:
    #   cums[b, i] = sum_{j >= i} ex[b, j] = (ex @ tri)[b, i],  tri[j, i] = (j >= i)
    cums = jnp.dot(ex, tri_ref[...], preferred_element_type=jnp.float32)

    obs = jnp.log(cums + jnp.float32(eps)) - x   # masked lanes -> +inf ...
    obs = jnp.where(mask, jnp.float32(0.0), obs)  # ... zeroed here (before any reduce)
    out_ref[0] = jnp.sum(obs, axis=0, keepdims=True)   # (1, N_pad) partial sums


def _listmle_scan_kernel(preds_ref, stepmask_ref, out_ref, *, eps):
    # Fallback for very large N_pad: Hillis-Steele suffix scan on the XLU with
    # precomputed resident step masks (one multiply per step, no iota/compare).
    preds = preds_ref[...].astype(jnp.float32)
    neg_inf = jnp.float32(-jnp.inf)
    mask = preds == neg_inf

    max_pred = jnp.max(preds, axis=-1, keepdims=True)
    max_pred = jnp.where(max_pred == neg_inf, jnp.float32(0.0), max_pred)

    x = preds - max_pred
    ex = jnp.exp(x)

    _, n = ex.shape
    cums = ex
    k, s = 0, 1
    while s < n:                                           # unrolls at trace time
        rolled = pltpu.roll(cums, shift=n - s, axis=1)     # rolled[i] = cums[(i+s) % n]
        cums = cums + rolled * stepmask_ref[pl.ds(k, 1), :]
        k, s = k + 1, s * 2

    obs = jnp.log(cums + jnp.float32(eps)) - x
    obs = jnp.where(mask, jnp.float32(0.0), obs)
    out_ref[0] = jnp.sum(obs, axis=0, keepdims=True)


def _round_up(v, m):
    return (v + m - 1) // m * m


def _plan(batch, n_pad, in_itemsize, use_mxu):
    """Pick the batch tile and an explicit scoped-VMEM limit."""
    # Resident second operand (Pallas double-buffers every input).
    if use_mxu:
        aux_bytes = 2 * n_pad * n_pad * 4
    else:
        n_steps = max(1, (n_pad - 1).bit_length())
        aux_bytes = 2 * n_steps * n_pad * 4
    # Per batch-row VMEM: 2 pipelined input buffers (native dtype) plus ~8
    # live f32 temporaries (preds, mask, x, ex, cums, obs, slack).
    per_row = n_pad * (2 * in_itemsize + 8 * 4)
    tb = (_VMEM_BUDGET - aux_bytes) // per_row // 8 * 8
    tb = int(max(8, min(512, tb)))
    # v7x has 2 TensorCores: keep >= 2 grid tiles whenever the batch allows.
    tb = min(tb, _round_up(max(-(-batch // 2), 8), 8))
    est = aux_bytes + tb * per_row + 4 * n_pad * 4 + (1 << 20)
    vmem_limit = int(min(48 * 1024 * 1024, max(16 * 1024 * 1024, 2 * est)))
    return tb, vmem_limit


def listmle_loss(student_top1_sim_pred, teacher_top1_sim_pred, shuffle_key,
                 gamma_=GAMMA_, eps=EPS):
    """Forward pass of the PyTorch ListMLE module."""
    y_pred = student_top1_sim_pred
    y_true = teacher_top1_sim_pred
    B, N = y_pred.shape

    # torch.randperm: random column shuffle (only affects sort tie-breaking).
    perm = jax.random.permutation(shuffle_key, N)
    y_true_sh = y_true[:, perm]

    # Descending teacher sort, composed with the shuffle so the student scores
    # need only ONE gather (perm[order]).
    # TODO(synk): the data-dependent sort/gather stays in the XLA prologue;
    # Mosaic has no clean in-kernel sort.
    order = jnp.argsort(-y_true_sh, axis=-1)
    y_true_sorted = jnp.take_along_axis(y_true_sh, order, axis=-1)
    preds_sorted = jnp.take_along_axis(y_pred, perm[order], axis=-1)

    # Fold the mask into the single student-score stream: teacher == -1 (and,
    # below, all padding) becomes -inf, which the kernel detects directly.
    neg_inf = jnp.array(-jnp.inf, dtype=preds_sorted.dtype)
    preds_sorted = jnp.where(y_true_sorted == -1.0, neg_inf, preds_sorted)

    # Pad to TPU-friendly shapes: lanes to a multiple of 128, batch to a
    # multiple of the tile. All padding is -inf => fully masked => contributes 0.
    n_pad = _round_up(N, 128)
    use_mxu = n_pad <= _MXU_MAX_N_PAD
    itemsize = jnp.dtype(preds_sorted.dtype).itemsize
    tb, vmem_limit = _plan(B, n_pad, itemsize, use_mxu)
    b_pad = _round_up(B, tb)
    num_tiles = b_pad // tb

    preds_p = jnp.pad(preds_sorted, ((0, b_pad - B), (0, n_pad - N)),
                      constant_values=-jnp.inf)

    if use_mxu:
        kernel = functools.partial(_listmle_mxu_kernel, eps=eps)
        # tri[j, i] = 1.0 iff j >= i  =>  (ex @ tri)[b, i] = suffix-sum of ex.
        row = jax.lax.broadcasted_iota(jnp.int32, (n_pad, n_pad), 0)
        col = jax.lax.broadcasted_iota(jnp.int32, (n_pad, n_pad), 1)
        aux = (row >= col).astype(jnp.float32)
        aux_spec = pl.BlockSpec((n_pad, n_pad), lambda i: (0, 0))     # resident
    else:
        kernel = functools.partial(_listmle_scan_kernel, eps=eps)
        shifts = []
        s = 1
        while s < n_pad:
            shifts.append(s)
            s *= 2
        lane = jnp.arange(n_pad)[None, :]
        aux = (lane < (n_pad - jnp.asarray(shifts))[:, None]).astype(jnp.float32)
        aux_spec = pl.BlockSpec((len(shifts), n_pad), lambda i: (0, 0))  # resident

    partials = pl.pallas_call(
        kernel,
        out_shape=jax.ShapeDtypeStruct((num_tiles, 1, n_pad), jnp.float32),
        grid=(num_tiles,),
        in_specs=[
            pl.BlockSpec((tb, n_pad), lambda i: (i, 0)),
            aux_spec,
        ],
        out_specs=pl.BlockSpec((1, 1, n_pad), lambda i: (i, 0, 0)),
        compiler_params=pltpu.CompilerParams(
            dimension_semantics=("parallel",),
            vmem_limit_bytes=vmem_limit),
    )(preds_p, aux)

    # mean over the ORIGINAL batch size, scaled by gamma_.
    return jnp.float32(gamma_) * jnp.sum(partials) / jnp.float32(B)


def _listmle_reference(student, teacher, perm, gamma_=GAMMA_, eps=EPS):
    """Pure-JAX transcription of the PyTorch forward (verification only)."""
    y_pred = student.astype(jnp.float32)[:, perm]
    y_true = teacher.astype(jnp.float32)[:, perm]
    order = jnp.argsort(-y_true, axis=-1)
    y_true_sorted = jnp.take_along_axis(y_true, order, axis=-1)
    preds = jnp.take_along_axis(y_pred, order, axis=-1)
    mask = y_true_sorted == -1.0
    preds = jnp.where(mask, -jnp.inf, preds)
    mx = jnp.max(preds, axis=-1, keepdims=True)
    x = preds - mx
    ex = jnp.exp(x)
    cums = jnp.cumsum(ex[:, ::-1], axis=-1)[:, ::-1]
    obs = jnp.log(cums + eps) - x
    obs = jnp.where(mask, 0.0, obs)
    return gamma_ * jnp.mean(jnp.sum(obs, axis=-1))


if __name__ == "__main__":
    key = jax.random.PRNGKey(0)
    k_pred, k_true, k_shuffle = jax.random.split(key, 3)

    B, N = 4, 16
    student = jax.random.normal(k_pred, (B, N), dtype=jnp.float32)
    teacher = jax.random.normal(k_true, (B, N), dtype=jnp.float32)
    # exercise the "teacher == -1 -> masked" path on a couple of entries
    teacher = teacher.at[0, 3].set(-1.0)
    teacher = teacher.at[2, 7].set(-1.0)

    loss = jax.jit(listmle_loss)(student, teacher, k_shuffle)
    jax.block_until_ready(loss)

    # sanity-check against a pure-JAX transcription of the PyTorch math
    perm = jax.random.permutation(k_shuffle, N)
    ref = _listmle_reference(student, teacher, perm)
    if not jnp.allclose(loss, ref, rtol=1e-4, atol=1e-5):
        raise AssertionError(f"kernel={float(loss):.8f} reference={float(ref):.8f}")
    print("KERNEL_OK")
</pallas_src>

<mosaic_0001>
module attributes {stable_mosaic.version = 11 : i64} {
  func.func @_listmle_mxu_kernel(%arg0: i32, %arg1: memref<8x128xf32, #tpu.memory_space<vmem>>, %arg2: memref<128x128xf32, #tpu.memory_space<vmem>>, %arg3: memref<1x1x128xf32, #tpu.memory_space<vmem>>) attributes {dimension_semantics = [#tpu.dimension_semantics<parallel>], iteration_bounds = array<i64: 1>, scalar_prefetch = 0 : i64, scratch_operands = 0 : i64, tpu.core_type = #tpu.core_type<tc>, window_params = [{transform_indices = @transform_0, window_bounds = array<i64: 8, 128>}, {pipeline_mode = #tpu.pipeline_mode<synchronous>, transform_indices = @transform_1, window_bounds = array<i64: 128, 128>}, {transform_indices = @transform_2, window_bounds = array<i64: 1, 1, 128>}]} {
    %c0 = arith.constant 0 : index
    %c0_0 = arith.constant 0 : index
    %0 = vector.load %arg1[%c0, %c0_0] : memref<8x128xf32, #tpu.memory_space<vmem>>, vector<8x128xf32>
    %cst = arith.constant 0xFF800000 : f32
    %1 = vector.broadcast %cst : f32 to vector<8x128xf32>
    %2 = arith.cmpf oeq, %0, %1 : vector<8x128xf32>
    %cst_1 = arith.constant dense<0xFF800000> : vector<8xf32>
    %3 = vector.multi_reduction <maximumf>, %0, %cst_1 [1] : vector<8x128xf32> to vector<8xf32>
    %4 = vector.shape_cast %3 : vector<8xf32> to vector<8x1xf32>
    %cst_2 = arith.constant 0xFF800000 : f32
    %5 = vector.broadcast %cst_2 : f32 to vector<8x1xf32>
    %6 = arith.cmpf oeq, %4, %5 : vector<8x1xf32>
    %cst_3 = arith.constant 0.000000e+00 : f32
    %7 = vector.broadcast %cst_3 : f32 to vector<8x1xf32>
    %8 = arith.select %6, %7, %4 : vector<8x1xi1>, vector<8x1xf32>
    %9 = vector.broadcast %8 : vector<8x1xf32> to vector<8x128xf32>
    %10 = arith.subf %0, %9 : vector<8x128xf32>
    %11 = math.exp %10 : vector<8x128xf32>
    %c0_4 = arith.constant 0 : index
    %c0_5 = arith.constant 0 : index
    %12 = vector.load %arg2[%c0_4, %c0_5] : memref<128x128xf32, #tpu.memory_space<vmem>>, vector<128x128xf32>
    %cst_6 = arith.constant dense<0.000000e+00> : vector<8x128xf32>
    %13 = tpu.matmul %11, %12, %cst_6 {dimension_numbers = #tpu.dot_dimension_numbers<[1], [0], [0], [1], [0, 0, 1, 1], [], []>} : vector<8x128xf32>, vector<128x128xf32>, vector<8x128xf32> -> vector<8x128xf32>
    %cst_7 = arith.constant 1.000000e-07 : f32
    %14 = vector.broadcast %cst_7 : f32 to vector<8x128xf32>
    %15 = arith.addf %13, %14 : vector<8x128xf32>
    %16 = math.log %15 : vector<8x128xf32>
    %17 = arith.subf %16, %10 : vector<8x128xf32>
    %cst_8 = arith.constant 0.000000e+00 : f32
    %18 = vector.broadcast %cst_8 : f32 to vector<8x128xf32>
    %19 = arith.select %2, %18, %17 : vector<8x128xi1>, vector<8x128xf32>
    %cst_9 = arith.constant dense<0.000000e+00> : vector<128xf32>
    %20 = vector.multi_reduction <add>, %19, %cst_9 [0] : vector<8x128xf32> to vector<128xf32>
    %21 = vector.shape_cast %20 : vector<128xf32> to vector<1x128xf32>
    %c0_10 = arith.constant 0 : index
    %c0_11 = arith.constant 0 : index
    %c0_12 = arith.constant 0 : index
    %22 = vector.load %arg3[%c0_10, %c0_11, %c0_12] : memref<1x1x128xf32, #tpu.memory_space<vmem>>, vector<1x1x128xf32>
    %23 = vector.shape_cast %22 : vector<1x1x128xf32> to vector<1x128xf32>
    %24 = vector.shape_cast %21 : vector<1x128xf32> to vector<1x1x128xf32>
    tpu.vector_store %arg3[%c0_10, %c0_11, %c0_12], %24 {strides = array<i32>} : memref<1x1x128xf32, #tpu.memory_space<vmem>>, vector<1x1x128xf32>,
    return
  }
  func.func @transform_0(%arg0: i32) -> (i32, i32) {
    %c0_i32 = arith.constant 0 : i32
    %c0_i32_0 = arith.constant 0 : i32
    return %arg0, %c0_i32 : i32, i32
  }
  func.func @transform_1(%arg0: i32) -> (i32, i32) {
    %c0_i32 = arith.constant 0 : i32
    %c0_i32_0 = arith.constant 0 : i32
    %c0_i32_1 = arith.constant 0 : i32
    return %c0_i32, %c0_i32_0 : i32, i32
  }
  func.func @transform_2(%arg0: i32) -> (i32, i32, i32) {
    %c0_i32 = arith.constant 0 : i32
    %c0_i32_0 = arith.constant 0 : i32
    %c0_i32_1 = arith.constant 0 : i32
    return %arg0, %c0_i32, %c0_i32_0 : i32, i32, i32
  }
}

</mosaic_0001>

<bundles_post_ra>
// kernel: listmle_loss.1
= control target key start
LH: loop header
LB: loop body
LE: loop exit
PB: predicated region body
PF: predicated region fallthrough
CT: control target
= control target key end

     0   :  { %s144_s0 = inlined_call_operand.vmem [shape: f32[8,128], index: 0, kind: input, shape index: {}]   ;;  %s145_s1 = inlined_call_operand.vmem [shape: f32[128,128], index: 1, kind: input, shape index: {}]   ;;  %s146_s2 = inlined_call_operand.vmem [shape: f32[1,1,128], index: 2, kind: output, shape index: {}]  }
   0x1   :  { %v11_v0 = vld [vmem:[%s144_s0] sm:$0xff]  ;;  %v35_v1 = vld [vmem:[%s145_s1 + $0x78] sm:$0xff]  ;;  %v34_v2 = vld [vmem:[%s145_s1 + $0x70] sm:$0xff] }
   0x2   :  { %13 = vmax.xlane.f32.xlu0 %v11_v0  ;;  %36 = vmatpush.msra.mxu0 %v35_v1  ;;  %v33_v3 = vld [vmem:[%s145_s1 + $0x68] sm:$0xff]  ;;  %v32_v4 = vld [vmem:[%s145_s1 + $0x60] sm:$0xff]  ;;  %v31_v5 = vld [vmem:[%s145_s1 + $0x58] sm:$0xff]  ;;  %vm12_vm1 = vcmp.eq.f32.partialorder %v11_v0, -inf }
   0x3   :  { %v30_v6 = vld [vmem:[%s145_s1 + $0x50] sm:$0xff]  ;;  %v29_v7 = vld [vmem:[%s145_s1 + $0x48] sm:$0xff]  ;;  %v28_v8 = vld [vmem:[%s145_s1 + $0x40] sm:$0xff] }
   0x4   :  { %37 = vmatpush.msra.mxu0 %v34_v2  ;;  %v27_v9 = vld [vmem:[%s145_s1 + $0x38] sm:$0xff]  ;;  %v26_v10 = vld [vmem:[%s145_s1 + $0x30] sm:$0xff]  ;;  %v25_v11 = vld [vmem:[%s145_s1 + $0x28] sm:$0xff] }
   0x5   :  { %v24_v12 = vld [vmem:[%s145_s1 + $0x20] sm:$0xff]  ;;  %v23_v13 = vld [vmem:[%s145_s1 + $0x18] sm:$0xff]  ;;  %v22_v14 = vld [vmem:[%s145_s1 + $0x10] sm:$0xff] }
   0x6   :  { %38 = vmatpush.msra.mxu0 %v33_v3  ;;  %v21_v15 = vld [vmem:[%s145_s1 + $0x8] sm:$0xff]  ;;  %v20_v16 = vld [vmem:[%s145_s1] sm:$0xff] }
   0x8   :  { %39 = vmatpush.msra.mxu0 %v32_v4 }
   0xa   :  { %40 = vmatpush.msra.mxu0 %v31_v5 }
   0xc   :  { %41 = vmatpush.msra.mxu0 %v30_v6 }
   0xe   :  { %42 = vmatpush.msra.mxu0 %v29_v7 }
  0x10   :  { %43 = vmatpush.msra.mxu0 %v28_v8 }
  0x12   :  { %44 = vmatpush.msra.mxu0 %v27_v9 }
  0x14   :  { %45 = vmatpush.msra.mxu0 %v26_v10 }
  0x16   :  { %46 = vmatpush.msra.mxu0 %v25_v11 }
  0x18   :  { %47 = vmatpush.msra.mxu0 %v24_v12 }
  0x1a   :  { %48 = vmatpush.msra.mxu0 %v23_v13 }
  0x1c   :  { %49 = vmatpush.msra.mxu0 %v22_v14 }
  0x1e   :  { %50 = vmatpush.msra.mxu0 %v21_v15 }
  0x20   :  { %51 = vmatpush.msra.mxu0 %v20_v16 }
  0x75   :  { %v14_v17 = vpop.xlane.xlu0 %13 }
  0x76   :  { %vm15_vm0 = vcmp.eq.f32.partialorder %v14_v17, -inf }
  0x77   :  { %v16_v18 = vsel %vm15_vm0, 0.0, %v14_v17 }
  0x78   :  { %v17_v19 = vsub.f32 %v11_v0, %v16_v18 }
  0x7a   :  { %v18_v20 = vmul.f32 1.442695, %v17_v19 }
  0x7c   :  { %71 = vpow2.f32 %v18_v20 }
  0x82   :  { %v72_v21 = vpop.eup %71 }
  0x83   :  { %52 = vmatmul.f32.vlgmr.msra.gmra.mxu0 %v72_v21 }
 0x100   :  { %v53_v22 = vpop.f32.mrf.mxu0 }
 0x101   :  { %v54_v23 = vadd.f32 1e-07, %v53_v22 }
 0x103   :  { %73 = vlog2.f32 %v54_v23 }
 0x109   :  { %v74_v24 = vpop.eup %73 }
 0x10a   :  { %v57_v25 = vmul.f32 0.6931472, %v74_v24 }
 0x10c   :  { %v58_v26 = vsub.f32 %v57_v25, %v17_v19 }
 0x10e   :  { %v59_v27 = vsel %vm12_vm1, 0.0, %v58_v26 }
 0x10f   :  { %v60_v28 = vrot.slane %v59_v27, 4 }
 0x111   :  { %v61_v29 = vadd.f32 %v60_v28, %v59_v27 }
 0x113   :  { %v62_v30 = vrot.slane %v61_v29, 2 }
 0x115   :  { %v63_v31 = vadd.f32 %v62_v30, %v61_v29 }
 0x117   :  { %v64_v32 = vrot.slane %v63_v31, 1 }
 0x119   :  { %v65_v33 = vadd.f32 %v64_v32, %v63_v31 }
 0x11b   :  { %66 = vst [vmem:[%s146_s2] sm:$0x1] %v65_v33 }

</bundles_post_ra>
